<compile_context>
chip_gen: v7x
topology: tpu7x:2x2x1
jax: 0.10.0
libtpu: 0.0.40
codegen_flags: <defaults>
</compile_context>

<pallas_src>
import functools

import jax
import jax.numpy as jnp
from jax.experimental import pallas as pl
from jax.experimental.pallas import tpu as pltpu

_LANES = 128
_SUBLANES = 8


def _wan_loss_elem(x, t, gamma):
    """Per-element WAN loss (used for ragged tails / tiny inputs)."""
    x = x.astype(jnp.float32)
    t = t.astype(jnp.float32)
    sp = jnp.log1p(jnp.exp(-jnp.abs(x)))
    bce = jnp.maximum(x, 0.0) - x * t + sp
    return bce * jnp.where(t == 1.0, jnp.float32(1.0), jnp.float32(gamma))


def _wan_loss_kernel(x_ref, t_ref, acc_ref, *, gamma, valid_rows, block_rows,
                     blocks_per_core, needs_mask):
    c = pl.program_id(0)          # core / partial-output axis ("parallel")
    i = pl.program_id(1)          # reduction axis ("arbitrary")

    @pl.when(i == 0)
    def _():
        acc_ref[...] = jnp.zeros_like(acc_ref)

    # Inputs stay in their storage dtype in HBM (bf16 halves HBM traffic);
    # cast on the VPU where there is slack.
    x = x_ref[...].astype(jnp.float32)
    t = t_ref[...].astype(jnp.float32)

    # BCEWithLogits(x, t) = max(x,0) - x*t + log1p(exp(-|x|)).
    # Identity: BCE(-x, 1-t) == BCE(x, t), so the whole WAN loss is
    #   loss = BCE(x,t) * (t==1 ? 1 : gamma)
    # -> one exp + one log1p (EUP) and ~9 VALU ops per element.
    sp = jnp.log1p(jnp.exp(-jnp.abs(x)))
    bce = jnp.maximum(x, 0.0) - x * t + sp
    loss = bce * jnp.where(t == 1.0, jnp.float32(1.0), jnp.float32(gamma))

    def accumulate(vals):
        # (br,128) -> (br/8, 8, 128) is (8,128)-tile aligned (a view); the
        # axis-0 sum is a pure chain of vreg adds into the resident (8,128)
        # accumulator -- no per-step cross-lane reduction, no scalar chain.
        acc_ref[...] += vals.reshape(-1, _SUBLANES, _LANES).sum(axis=0)

    if not needs_mask:
        accumulate(loss)
    else:
        # Row-index based masking (int32-safe for any realistic numel); only
        # the block straddling / beyond the boundary pays for the iota mask.
        row0 = (c * blocks_per_core + i) * block_rows

        @pl.when(row0 + block_rows <= valid_rows)
        def _():
            accumulate(loss)

        @pl.when(row0 + block_rows > valid_rows)
        def _():
            r = jax.lax.broadcasted_iota(jnp.int32, loss.shape, 0)
            accumulate(jnp.where(row0 + r < valid_rows, loss, 0.0))


def wan_loss(x, target, gamma, reduction="mean", block_rows=4096):
    assert x.shape == target.shape
    assert 0.0 <= gamma <= 1.0
    assert reduction in ("sum", "mean")

    numel = x.size
    assert numel > 0
    scale = (1.0 / numel) if reduction == "mean" else 1.0

    xf = x.reshape(-1)
    tf = target.reshape(-1)

    aligned = (numel // _LANES) * _LANES
    rows = aligned // _LANES

    total = jnp.float32(0.0)

    if rows < _SUBLANES:
        # Tiny input (< 1 KiB of elements): not worth a kernel launch.
        total = jnp.sum(_wan_loss_elem(xf, tf, gamma))
        return total * jnp.float32(scale)

    if aligned != numel:
        # <128-element ragged tail: plain jnp; kernel runs on the aligned
        # prefix.  (Common case numel % 128 == 0 is a FREE reshape, no copies.)
        total = total + jnp.sum(_wan_loss_elem(xf[aligned:], tf[aligned:], gamma))
        xk, tk = xf[:aligned], tf[:aligned]
    else:
        xk, tk = xf, tf

    x2 = xk.reshape(rows, _LANES)
    t2 = tk.reshape(rows, _LANES)

    # Row tile: multiple of 8 (sublane) and <= rows.  Default 4096 rows ->
    # 2 MiB f32 per input block; with two inputs x double buffering = 8 MiB
    # in flight, within the 48 MiB scoped-VMEM limit set below on every chip.
    br = max(_SUBLANES, (min(int(block_rows), rows) // _SUBLANES) * _SUBLANES)
    nblocks = pl.cdiv(rows, br)

    # Leading "parallel" axis: on 2-TC chips (v7x) each core streams half the
    # blocks into its own resident accumulator; on 1-TC chips it is just a
    # serial reorganization of the same work.
    nc = 2 if nblocks >= 2 else 1
    spc = pl.cdiv(nblocks, nc)              # blocks per core

    # Mask needed iff the last real block is partial in rows, or the
    # rectangular (nc, spc) grid overshoots the real block count.
    needs_mask = (nblocks * br != rows) or (nc * spc != nblocks)

    if nc * spc == nblocks:
        def in_map(c, i):
            return (c * spc + i, 0)
    else:
        # Grid overshoot: clamp the DMA to the last real block (stays in
        # bounds); its duplicate contribution is masked to zero in-kernel.
        def in_map(c, i):
            return (jnp.minimum(c * spc + i, nblocks - 1), 0)

    kernel = functools.partial(
        _wan_loss_kernel,
        gamma=float(gamma),
        valid_rows=int(rows),
        block_rows=int(br),
        blocks_per_core=int(spc),
        needs_mask=bool(needs_mask),
    )

    acc = pl.pallas_call(
        kernel,
        # One (8,128) f32 accumulator slab per core, stacked along rows.
        out_shape=jax.ShapeDtypeStruct((nc * _SUBLANES, _LANES), jnp.float32),
        grid_spec=pltpu.PrefetchScalarGridSpec(
            num_scalar_prefetch=0,
            grid=(nc, spc),
            in_specs=[
                pl.BlockSpec((br, _LANES), in_map),
                pl.BlockSpec((br, _LANES), in_map),
            ],
            # Output block index is constant along the reduction axis -> the
            # accumulator stays resident in VMEM and is written back once per
            # core.
            out_specs=pl.BlockSpec((_SUBLANES, _LANES), lambda c, i: (c, 0)),
        ),
        compiler_params=pltpu.CompilerParams(
            dimension_semantics=("parallel", "arbitrary"),
            vmem_limit_bytes=48 * 1024 * 1024,
        ),
    )(x2, t2)

    # Single cross-lane reduction (over nc*8*128 partials) + scaling, in XLA.
    total = total + jnp.sum(acc)
    return total * jnp.float32(scale)


def _wan_loss_ref(x, target, gamma, reduction="mean"):
    """Pure-JAX reference mirroring the PyTorch module (un-simplified form)."""
    x = x.astype(jnp.float32)
    t = target.astype(jnp.float32)

    def bce(z, y):
        return jnp.maximum(z, 0.0) - z * y + jnp.log1p(jnp.exp(-jnp.abs(z)))

    pos = jnp.where(t == 1.0, bce(x, t), 0.0)
    neg = gamma * jnp.where(t != 1.0, bce(-x, 1.0 - t), 0.0)
    s = jnp.sum(pos) + jnp.sum(neg)
    return s / x.size if reduction == "mean" else s


if __name__ == "__main__":
    gamma = 0.3  # deterministic module hyper-parameter (no learnable weights)

    key = jax.random.PRNGKey(0)

    # (shape, block_rows override): covers aligned single-block, ragged tail +
    # partial row block, even 2-core split, uneven split (clamped index_map),
    # and the tiny pure-jnp fallback path.
    cases = [
        ((2, 4, 16, 16), None),
        ((3, 5, 7, 11), None),
        ((2, 4, 16, 16), 8),
        ((3, 8, 128), 8),
        ((4, 13), None),
    ]

    for shape, br_override in cases:
        key, k_x, k_t = jax.random.split(key, 3)
        x = jax.random.normal(k_x, shape, dtype=jnp.float32)
        target = jax.random.bernoulli(k_t, p=0.25, shape=shape).astype(jnp.float32)

        for reduction in ("mean", "sum"):
            kwargs = {} if br_override is None else {"block_rows": br_override}
            out = jax.block_until_ready(
                wan_loss(x, target, gamma, reduction=reduction, **kwargs))
            ref = jax.block_until_ready(
                _wan_loss_ref(x, target, gamma, reduction=reduction))
            assert jnp.allclose(out, ref, rtol=1e-5, atol=1e-5), (
                shape, br_override, reduction, out, ref)

    print("KERNEL_OK")
</pallas_src>

<mosaic_0001>
module attributes {stable_mosaic.version = 11 : i64} {
  func.func @_wan_loss_kernel(%arg0: i32, %arg1: i32, %arg2: memref<16x128xf32, #tpu.memory_space<vmem>>, %arg3: memref<16x128xf32, #tpu.memory_space<vmem>>, %arg4: memref<8x128xf32, #tpu.memory_space<vmem>>) attributes {dimension_semantics = [#tpu.dimension_semantics<parallel>, #tpu.dimension_semantics<arbitrary>], iteration_bounds = array<i64: 1, 1>, scalar_prefetch = 0 : i64, scratch_operands = 0 : i64, tpu.core_type = #tpu.core_type<tc>, window_params = [{transform_indices = @transform_0, window_bounds = array<i64: 16, 128>}, {transform_indices = @transform_1, window_bounds = array<i64: 16, 128>}, {transform_indices = @transform_2, window_bounds = array<i64: 8, 128>}]} {
    %c0_i32 = arith.constant 0 : i32
    %0 = arith.cmpi eq, %arg1, %c0_i32 : i32
    %1 = arith.extui %0 : i1 to i32
    %c0_i32_0 = arith.constant 0 : i32
    %2 = arith.cmpi ne, %1, %c0_i32_0 : i32
    scf.if %2 {
      %cst_13 = arith.constant 0.000000e+00 : f32
      %26 = vector.broadcast %cst_13 : f32 to vector<8x128xf32>
      %c0_14 = arith.constant 0 : index
      %c0_15 = arith.constant 0 : index
      %27 = vector.load %arg4[%c0_14, %c0_15] : memref<8x128xf32, #tpu.memory_space<vmem>>, vector<8x128xf32>
      tpu.vector_store %arg4[%c0_14, %c0_15], %26 {strides = array<i32>} : memref<8x128xf32, #tpu.memory_space<vmem>>, vector<8x128xf32>,
    } else {
    }
    %c0 = arith.constant 0 : index
    %c0_1 = arith.constant 0 : index
    %3 = vector.load %arg2[%c0, %c0_1] : memref<16x128xf32, #tpu.memory_space<vmem>>, vector<16x128xf32>
    %c0_2 = arith.constant 0 : index
    %c0_3 = arith.constant 0 : index
    %4 = vector.load %arg3[%c0_2, %c0_3] : memref<16x128xf32, #tpu.memory_space<vmem>>, vector<16x128xf32>
    %5 = math.absf %3 : vector<16x128xf32>
    %cst = arith.constant 0.000000e+00 : f32
    %6 = vector.broadcast %cst : f32 to vector<16x128xf32>
    %7 = arith.subf %6, %5 : vector<16x128xf32>
    %8 = math.exp %7 : vector<16x128xf32>
    %9 = math.log1p %8 : vector<16x128xf32>
    %cst_4 = arith.constant 0.000000e+00 : f32
    %10 = vector.broadcast %cst_4 : f32 to vector<16x128xf32>
    %11 = arith.maximumf %3, %10 : vector<16x128xf32>
    %12 = arith.mulf %3, %4 : vector<16x128xf32>
    %13 = arith.subf %11, %12 : vector<16x128xf32>
    %14 = arith.addf %13, %9 : vector<16x128xf32>
    %cst_5 = arith.constant 1.000000e+00 : f32
    %15 = vector.broadcast %cst_5 : f32 to vector<16x128xf32>
    %16 = arith.cmpf oeq, %4, %15 : vector<16x128xf32>
    %cst_6 = arith.constant 1.000000e+00 : f32
    %cst_7 = arith.constant 3.000000e-01 : f32
    %17 = vector.broadcast %cst_6 : f32 to vector<16x128xf32>
    %18 = vector.broadcast %cst_7 : f32 to vector<16x128xf32>
    %19 = arith.select %16, %17, %18 : vector<16x128xi1>, vector<16x128xf32>
    %20 = arith.mulf %14, %19 : vector<16x128xf32>
    %c0_8 = arith.constant 0 : index
    %c0_9 = arith.constant 0 : index
    %21 = vector.load %arg4[%c0_8, %c0_9] : memref<8x128xf32, #tpu.memory_space<vmem>>, vector<8x128xf32>
    %22 = vector.shape_cast %20 : vector<16x128xf32> to vector<2x8x128xf32>
    %cst_10 = arith.constant dense<0.000000e+00> : vector<8x128xf32>
    %23 = vector.multi_reduction <add>, %22, %cst_10 [0] : vector<2x8x128xf32> to vector<8x128xf32>
    %24 = arith.addf %21, %23 : vector<8x128xf32>
    %c0_11 = arith.constant 0 : index
    %c0_12 = arith.constant 0 : index
    %25 = vector.load %arg4[%c0_11, %c0_12] : memref<8x128xf32, #tpu.memory_space<vmem>>, vector<8x128xf32>
    tpu.vector_store %arg4[%c0_11, %c0_12], %24 {strides = array<i32>} : memref<8x128xf32, #tpu.memory_space<vmem>>, vector<8x128xf32>,
    return
  }
  func.func @transform_0(%arg0: i32, %arg1: i32) -> (i32, i32) {
    %c1_i32 = arith.constant 1 : i32
    %0 = arith.muli %arg0, %c1_i32 : i32
    %1 = arith.addi %0, %arg1 : i32
    %c0_i32 = arith.constant 0 : i32
    %c0_i32_0 = arith.constant 0 : i32
    return %1, %c0_i32 : i32, i32
  }
  func.func @transform_1(%arg0: i32, %arg1: i32) -> (i32, i32) {
    %c1_i32 = arith.constant 1 : i32
    %0 = arith.muli %arg0, %c1_i32 : i32
    %1 = arith.addi %0, %arg1 : i32
    %c0_i32 = arith.constant 0 : i32
    %c0_i32_0 = arith.constant 0 : i32
    return %1, %c0_i32 : i32, i32
  }
  func.func @transform_2(%arg0: i32, %arg1: i32) -> (i32, i32) {
    %c0_i32 = arith.constant 0 : i32
    %c0_i32_0 = arith.constant 0 : i32
    return %arg0, %c0_i32 : i32, i32
  }
}

</mosaic_0001>

<bundles_post_ra>
// kernel: tpu_custom_call.1
= control target key start
LH: loop header
LB: loop body
LE: loop exit
PB: predicated region body
PF: predicated region fallthrough
CT: control target
= control target key end

     0   :  { %7 = vsyncpa [#allocation3], 0  ;;  %s265_s0 = inlined_call_operand.hbm [shape: f32[16,128], index: 0, kind: input, shape index: {}]   ;;  %s266_s1 = inlined_call_operand.hbm [shape: f32[16,128], index: 1, kind: input, shape index: {}]   ;;  %s267_s2 = inlined_call_operand.hbm [shape: f32[8,128], index: 2, kind: output, shape index: {}]  }
   0x1   :  { %8 = vsyncpa [#allocation6], 0 }
   0x2   :  { %9 = vsyncpa [#allocation4], 0  ;;  %s208_s9 = smov [#allocation2]   ;;  %s136_s13 = scalar_lea.hbm %s265_s0, 256 }
   0x3   :  { %s19_s10 = sshll.u32 %s208_s9, 4  ;;  %p137_p0 = scmp.ne.s32.totalorder %s265_s0, %s136_s13  ;;  %s20_s10 = int_to_ptr.vmem [resolvable:$true] %s19_s10 }
   0x4   :  { %p140_p1 = scmp.lt.u32.totalorder %s136_s13, %s265_s0 }
   0x6   :  { %p142_p2 = pnand %p140_p1, %p137_p0 }
   0x8   :  { %145 = shalt.err (!%p142_p2)
}
   0x9   :  { %s146_s18 = scalar_lea.vmem %s20_s10, 256  ;;  %p151_p4 = scmp.lt.s32.totalorder %s20_s10, %s20_s10 }
   0xa   :  { %p147_p3 = scmp.ne.s32.totalorder %s20_s10, %s146_s18  ;;  %p152_p5 = scmp.lt.s32.totalorder %s146_s18, %s146_s18 }
   0xc   :  { %p153_p6 = por %p152_p5, %p151_p4 }
   0xe   :  { %p154_p7 = pnand %p153_p6, %p147_p3 }
  0x10   :  { %157 = shalt.err (!%p154_p7)
}
  0x11   :  { %s209_s19 = smov 128   ;;  %s210_s20 = smov 8  }
  0x12   :  { %25 = dma.hbm_to_vmem [thread:$0]  %s265_s0, 256, %s20_s10, [#allocation3], %s209_s19, %s209_s19, %s210_s20  }
  0x13   :  { %s211_s23 = smov [#allocation5]   ;;  %s158_s27 = scalar_lea.hbm %s266_s1, 256 }
  0x14   :  { %s35_s24 = sshll.u32 %s211_s23, 4  ;;  %p159_p8 = scmp.ne.s32.totalorder %s266_s1, %s158_s27  ;;  %s36_s24 = int_to_ptr.vmem [resolvable:$true] %s35_s24 }
  0x15   :  { %p162_p9 = scmp.lt.u32.totalorder %s158_s27, %s266_s1 }
  0x17   :  { %p164_p10 = pnand %p162_p9, %p159_p8 }
  0x19   :  { %167 = shalt.err (!%p164_p10)
}
  0x1a   :  { %s168_s4 = scalar_lea.vmem %s36_s24, 256  ;;  %p173_p12 = scmp.lt.s32.totalorder %s36_s24, %s36_s24 }
  0x1b   :  { %p169_p11 = scmp.ne.s32.totalorder %s36_s24, %s168_s4  ;;  %p174_p13 = scmp.lt.s32.totalorder %s168_s4, %s168_s4 }
  0x1d   :  { %p175_p0 = por %p174_p13, %p173_p12 }
  0x1f   :  { %p176_p1 = pnand %p175_p0, %p169_p11 }
  0x21   :  { %179 = shalt.err (!%p176_p1)
}
  0x22   :  { %41 = dma.hbm_to_vmem [thread:$0]  %s266_s1, 256, %s36_s24, [#allocation6], %s209_s19, %s209_s19, %s210_s20  }
  0x23   :  { %202 = dma.done.wait [#allocation3], 256  }
  0x24   :  { %203 = vsyncadd [#allocation3], 4294967040 }
  0x25   :  { %204 = dma.done.wait [#allocation6], 256  }
  0x26   :  { %205 = vsyncadd [#allocation6], 4294967040  ;;  %v57_v0 = vld [vmem:[#allocation2] sm:$0xff]  ;;  %v58_v1 = vld [vmem:[#allocation2 + $0x8] sm:$0xff]  ;;  %v212_v33 = vmov 0.3  }
  0x27   :  { %v61_v2 = vand.u32 2147483647, %v57_v0  ;;  %v62_v3 = vand.u32 2147483647, %v58_v1  ;;  %v59_v14 = vld [vmem:[#allocation5] sm:$0xff]  ;;  %v60_v15 = vld [vmem:[#allocation5 + $0x8] sm:$0xff] }
  0x28   :  { %v87_v19 = vmax.f32 %v57_v0, 0.0  ;;  %v89_v20 = vmul.f32 %v59_v14, %v57_v0  ;;  %v88_v22 = vmax.f32 %v58_v1, 0.0  ;;  %v90_v23 = vmul.f32 %v60_v15, %v58_v1  ;;  %s213_s1 = smov [#allocation7]  }
  0x29   :  { %v63_v4 = vsub.f32 0.0, %v61_v2  ;;  %v64_v5 = vsub.f32 0.0, %v62_v3  ;;  %vm95_vm1 = vcmp.eq.f32.partialorder %v59_v14, 1.0  ;;  %vm96_vm3 = vcmp.eq.f32.partialorder %v60_v15, 1.0  ;;  %s111_s6 = sshll.u32 %s213_s1, 4  ;;  %s112_s6 = int_to_ptr.vmem [resolvable:$true] %s111_s6 }
  0x2a   :  { %v91_v27 = vsub.f32 %v87_v19, %v89_v20  ;;  %v92_v30 = vsub.f32 %v88_v22, %v90_v23  ;;  %v97_v34 = vsel %vm95_vm1, 1.0, %v212_v33  ;;  %v98_v37 = vsel %vm96_vm3, 1.0, %v212_v33  ;;  %s180_s7 = scalar_lea.vmem %s112_s6, 128  ;;  %p185_p3 = scmp.lt.s32.totalorder %s112_s6, %s112_s6 }
  0x2b   :  { %v65_v6 = vmul.f32 1.442695, %v63_v4  ;;  %v67_v7 = vmul.f32 1.442695, %v64_v5  ;;  %p181_p2 = scmp.ne.s32.totalorder %s112_s6, %s180_s7  ;;  %p186_p4 = scmp.lt.s32.totalorder %s180_s7, %s180_s7 }
  0x2d   :  { %128 = vpow2.f32 %v65_v6  ;;  %p187_p5 = por %p186_p4, %p185_p3 }
  0x2e   :  { %130 = vpow2.f32 %v67_v7 }
  0x2f   :  { %p188_p6 = pnand %p187_p5, %p181_p2 }
  0x37   :  { %v129_v8 = vpop.eup %128 }
  0x38   :  { %v131_v9 = vpop.eup %130  ;;  %v69_v10 = vadd.f32 1.0, %v129_v8  ;;  %v72_v12 = vmul.f32 -0.5, %v129_v8  ;;  %v75_v17 = vand.u32 2147483647, %v129_v8 }
  0x39   :  { %v78_v11 = vadd.f32 1.0, %v131_v9  ;;  %v81_v13 = vmul.f32 -0.5, %v131_v9  ;;  %v84_v21 = vand.u32 2147483647, %v131_v9 }
  0x3a   :  { %132 = vlog2.f32 %v69_v10  ;;  %v73_v16 = vadd.f32 1.0, %v72_v12  ;;  %vm76_vm0 = vcmp.lt.f32.partialorder %v75_v17, 0.0004427343 }
  0x3b   :  { %134 = vlog2.f32 %v78_v11  ;;  %v82_v18 = vadd.f32 1.0, %v81_v13  ;;  %vm85_vm2 = vcmp.lt.f32.partialorder %v84_v21, 0.0004427343 }
  0x3c   :  { %v74_v24 = vmul.f32 %v129_v8, %v73_v16 }
  0x3d   :  { %v83_v26 = vmul.f32 %v131_v9, %v82_v18 }
  0x44   :  { %v133_v25 = vpop.eup %132 }
  0x45   :  { %v135_v28 = vpop.eup %134  ;;  %v71_v29 = vmul.f32 0.6931472, %v133_v25 }
  0x46   :  { %v80_v31 = vmul.f32 0.6931472, %v135_v28 }
  0x47   :  { %v77_v32 = vsel %vm76_vm0, %v74_v24, %v71_v29 }
  0x48   :  { %v86_v35 = vsel %vm85_vm2, %v83_v26, %v80_v31  ;;  %v93_v36 = vadd.f32 %v91_v27, %v77_v32 }
  0x49   :  { %v94_v38 = vadd.f32 %v92_v30, %v86_v35 }
  0x4a   :  { %v99_v39 = vmul.f32 %v97_v34, %v93_v36 }
  0x4b   :  { %v100_v40 = vmul.f32 %v98_v37, %v94_v38 }
  0x4d   :  { %v102_v41 = vadd.f32 %v100_v40, %v99_v39 }
  0x4f   :  { %104 = vst [vmem:[#allocation7] sm:$0xff] %v102_v41 }
  0x50   :  { %191 = shalt.err (!%p188_p6)
}
  0x51   :  { %s192_s10 = scalar_lea.hbm %s267_s2, 128 }
  0x52   :  { %p193_p7 = scmp.ne.s32.totalorder %s267_s2, %s192_s10  ;;  %p196_p8 = scmp.lt.u32.totalorder %s192_s10, %s267_s2 }
  0x54   :  { %p198_p9 = pnand %p196_p8, %p193_p7 }
  0x56   :  { %201 = shalt.err (!%p198_p9)
}
  0x57   :  { %114 = dma.vmem_to_hbm [thread:$0]  %s112_s6, 128, %s267_s2, [#allocation4]  }
  0x58   :  { %206 = dma.done.wait [#allocation4], 128  }
  0x59   :  { %207 = vsyncadd [#allocation4], 4294967168 }
  0x5a   :  { %118 = vsyncpa [#allocation3], 1 }
  0x5b   :  { %119 = vsyncpa [#allocation6], 1 }
  0x5c   :  { %120 = vsyncpa [#allocation4], 1 }

</bundles_post_ra>
